<compile_context>
chip_gen: v5e
topology: v5e:2x2
jax: 0.10.0
libtpu: 0.0.40
codegen_flags: <defaults>
</compile_context>

<pallas_src>
import functools

import jax
import jax.numpy as jnp
from jax import lax
from jax.experimental import pallas as pl
from jax.experimental.pallas import tpu as pltpu


def _round_up(x, m):
    return ((x + m - 1) // m) * m


# Contract the feature axis of x (dim 1) with the in-feature axis (dim 1) of the
# PyTorch-layout (out, in) weight: y[b, o] = sum_i x[b, i] * w[o, i]  ==  x @ W^T.
_DN = (((1,), (1,)), ((), ()))


def actor_kernel(s_ref, w1_ref, b1_ref, w2_ref, b2_ref, w3_ref, b3_ref, o_ref):
    # Layer 1: Linear + ReLU  (f32 accumulation on the MXU)
    x = lax.dot_general(s_ref[...].astype(w1_ref.dtype), w1_ref[...], _DN,
                        preferred_element_type=jnp.float32)
    x = jnp.maximum(x + b1_ref[...], 0.0)
    # Layer 2: Linear + ReLU
    x = lax.dot_general(x.astype(w2_ref.dtype), w2_ref[...], _DN,
                        preferred_element_type=jnp.float32)
    x = jnp.maximum(x + b2_ref[...], 0.0)
    # Layer 3: Linear + tanh (out-dim lane-padded; padded lanes give tanh(0)=0)
    x = lax.dot_general(x.astype(w3_ref.dtype), w3_ref[...], _DN,
                        preferred_element_type=jnp.float32)
    o_ref[...] = jnp.tanh(x + b3_ref[...]).astype(o_ref.dtype)


def prepare_params(params, *, weight_dtype=jnp.float32):
    """One-time preprocessing (call once at init, NOT per forward).

    - Weights keep the PyTorch (out, in) layout; no transpose is materialized.
    - Biases become 2-D (1, out) rows for TPU lane layout.
    - The last layer's out-dim is padded to a multiple of 128 so the kernel's
      output store is lane-dense; the wrapper slices it back to n_actions.
    - Optionally cast weights to bf16 (the kernel still accumulates in f32).
    """
    a = params["w3"].shape[0]
    a_pad = _round_up(a, 128)
    w3 = jnp.pad(params["w3"], ((0, a_pad - a), (0, 0)))
    b3 = jnp.pad(params["b3"], ((0, a_pad - a),))
    return {
        "w1": params["w1"].astype(weight_dtype),
        "b1": params["b1"].astype(jnp.float32)[None, :],
        "w2": params["w2"].astype(weight_dtype),
        "b2": params["b2"].astype(jnp.float32)[None, :],
        "w3": w3.astype(weight_dtype),
        "b3": b3.astype(jnp.float32)[None, :],
    }


@functools.partial(jax.jit, static_argnames=("n_actions", "tile_b"))
def actor_forward(state, prep, *, n_actions, tile_b=512):
    """state: (B, n_states) f32.  prep: output of prepare_params."""
    B, n_states = state.shape
    H = prep["w1"].shape[0]
    a_pad = prep["w3"].shape[0]

    # Batch tiling: one grid axis over batch tiles; weights stay VMEM-resident.
    tb = min(tile_b, _round_up(B, 8))
    b_pad = _round_up(B, tb)
    if b_pad != B:
        state = jnp.pad(state, ((0, b_pad - B), (0, 0)))
    n_tiles = b_pad // tb

    def resident(arr):  # full array as one block, fetched once, reused per tile
        return pl.BlockSpec(arr.shape, lambda i: (0, 0))

    flops = 2 * b_pad * (n_states * H + H * H + H * a_pad)
    bytes_accessed = 4 * b_pad * (n_states + a_pad) + sum(
        int(v.size) * v.dtype.itemsize for v in prep.values())

    out = pl.pallas_call(
        actor_kernel,
        out_shape=jax.ShapeDtypeStruct((b_pad, a_pad), jnp.float32),
        grid=(n_tiles,),
        in_specs=[
            pl.BlockSpec((tb, n_states), lambda i: (i, 0)),
            resident(prep["w1"]), resident(prep["b1"]),
            resident(prep["w2"]), resident(prep["b2"]),
            resident(prep["w3"]), resident(prep["b3"]),
        ],
        out_specs=pl.BlockSpec((tb, a_pad), lambda i: (i, 0)),
        compiler_params=pltpu.CompilerParams(
            dimension_semantics=("parallel",),   # v7x: both TCs split the batch
            vmem_limit_bytes=32 << 20,           # safe on v5e/v6e/v7x
        ),
        cost_estimate=pl.CostEstimate(
            flops=flops,
            transcendentals=b_pad * a_pad,
            bytes_accessed=bytes_accessed,
        ),
    )(state, prep["w1"], prep["b1"], prep["w2"], prep["b2"],
      prep["w3"], prep["b3"])

    return out[:B, :n_actions]


def init_params(key, n_states, n_actions, hidden_dim):
    """Deterministic init mimicking nn.Linear default (uniform +-1/sqrt(fan_in))."""
    ks = jax.random.split(key, 6)

    def lin(kw, kb, fan_in, fan_out):
        bound = 1.0 / jnp.sqrt(jnp.float32(fan_in))
        w = jax.random.uniform(kw, (fan_out, fan_in), jnp.float32, -bound, bound)
        b = jax.random.uniform(kb, (fan_out,), jnp.float32, -bound, bound)
        return w, b

    w1, b1 = lin(ks[0], ks[1], n_states, hidden_dim)
    w2, b2 = lin(ks[2], ks[3], hidden_dim, hidden_dim)
    w3, b3 = lin(ks[4], ks[5], hidden_dim, n_actions)
    return {"w1": w1, "b1": b1, "w2": w2, "b2": b2, "w3": w3, "b3": b3}


def actor_ref(state, p):
    x = jnp.maximum(state @ p["w1"].T + p["b1"], 0.0)
    x = jnp.maximum(x @ p["w2"].T + p["b2"], 0.0)
    return jnp.tanh(x @ p["w3"].T + p["b3"])


if __name__ == "__main__":
    # hidden_dim matches the module default (256, lane-aligned); tiny batch demo.
    B, n_states, n_actions, hidden_dim = 2, 8, 4, 256

    key = jax.random.PRNGKey(0)
    k_params, k_state = jax.random.split(key)
    params = init_params(k_params, n_states, n_actions, hidden_dim)
    state = jax.random.normal(k_state, (B, n_states), jnp.float32)

    prep = prepare_params(params)  # one-time, outside the hot path
    out = actor_forward(state, prep, n_actions=n_actions)
    out = jax.block_until_ready(out)

    ref = actor_ref(state, params)
    assert out.shape == (B, n_actions), out.shape
    assert jnp.allclose(out, ref, atol=1e-5, rtol=1e-5), (out, ref)

    print("KERNEL_OK")
</pallas_src>

<mosaic_0001>
module attributes {stable_mosaic.version = 11 : i64} {
  func.func @actor_kernel(%arg0: i32, %arg1: memref<8x8xf32, #tpu.memory_space<vmem>>, %arg2: memref<256x8xf32, #tpu.memory_space<vmem>>, %arg3: memref<1x256xf32, #tpu.memory_space<vmem>>, %arg4: memref<256x256xf32, #tpu.memory_space<vmem>>, %arg5: memref<1x256xf32, #tpu.memory_space<vmem>>, %arg6: memref<128x256xf32, #tpu.memory_space<vmem>>, %arg7: memref<1x128xf32, #tpu.memory_space<vmem>>, %arg8: memref<8x128xf32, #tpu.memory_space<vmem>>) attributes {dimension_semantics = [#tpu.dimension_semantics<parallel>], iteration_bounds = array<i64: 1>, scalar_prefetch = 0 : i64, scratch_operands = 0 : i64, tpu.core_type = #tpu.core_type<tc>, window_params = [{transform_indices = @transform_0, window_bounds = array<i64: 8, 8>}, {pipeline_mode = #tpu.pipeline_mode<synchronous>, transform_indices = @transform_1, window_bounds = array<i64: 256, 8>}, {pipeline_mode = #tpu.pipeline_mode<synchronous>, transform_indices = @transform_2, window_bounds = array<i64: 1, 256>}, {pipeline_mode = #tpu.pipeline_mode<synchronous>, transform_indices = @transform_3, window_bounds = array<i64: 256, 256>}, {pipeline_mode = #tpu.pipeline_mode<synchronous>, transform_indices = @transform_4, window_bounds = array<i64: 1, 256>}, {pipeline_mode = #tpu.pipeline_mode<synchronous>, transform_indices = @transform_5, window_bounds = array<i64: 128, 256>}, {pipeline_mode = #tpu.pipeline_mode<synchronous>, transform_indices = @transform_6, window_bounds = array<i64: 1, 128>}, {transform_indices = @transform_7, window_bounds = array<i64: 8, 128>}]} {
    %c0 = arith.constant 0 : index
    %c0_0 = arith.constant 0 : index
    %0 = vector.load %arg1[%c0, %c0_0] : memref<8x8xf32, #tpu.memory_space<vmem>>, vector<8x8xf32>
    %c0_1 = arith.constant 0 : index
    %c0_2 = arith.constant 0 : index
    %1 = vector.load %arg2[%c0_1, %c0_2] : memref<256x8xf32, #tpu.memory_space<vmem>>, vector<256x8xf32>
    %cst = arith.constant dense<0.000000e+00> : vector<8x256xf32>
    %2 = tpu.matmul %0, %1, %cst {dimension_numbers = #tpu.dot_dimension_numbers<[1], [1], [0], [0], [0, 0, 1, 0], [], []>} : vector<8x8xf32>, vector<256x8xf32>, vector<8x256xf32> -> vector<8x256xf32>
    %c0_3 = arith.constant 0 : index
    %c0_4 = arith.constant 0 : index
    %3 = vector.load %arg3[%c0_3, %c0_4] : memref<1x256xf32, #tpu.memory_space<vmem>>, vector<1x256xf32>
    %4 = vector.broadcast %3 : vector<1x256xf32> to vector<8x256xf32>
    %5 = arith.addf %2, %4 : vector<8x256xf32>
    %cst_5 = arith.constant 0.000000e+00 : f32
    %6 = vector.broadcast %cst_5 : f32 to vector<8x256xf32>
    %7 = arith.maximumf %5, %6 : vector<8x256xf32>
    %c0_6 = arith.constant 0 : index
    %c0_7 = arith.constant 0 : index
    %8 = vector.load %arg4[%c0_6, %c0_7] : memref<256x256xf32, #tpu.memory_space<vmem>>, vector<256x256xf32>
    %cst_8 = arith.constant dense<0.000000e+00> : vector<8x256xf32>
    %9 = tpu.matmul %7, %8, %cst_8 {dimension_numbers = #tpu.dot_dimension_numbers<[1], [1], [0], [0], [0, 0, 1, 0], [], []>} : vector<8x256xf32>, vector<256x256xf32>, vector<8x256xf32> -> vector<8x256xf32>
    %c0_9 = arith.constant 0 : index
    %c0_10 = arith.constant 0 : index
    %10 = vector.load %arg5[%c0_9, %c0_10] : memref<1x256xf32, #tpu.memory_space<vmem>>, vector<1x256xf32>
    %11 = vector.broadcast %10 : vector<1x256xf32> to vector<8x256xf32>
    %12 = arith.addf %9, %11 : vector<8x256xf32>
    %cst_11 = arith.constant 0.000000e+00 : f32
    %13 = vector.broadcast %cst_11 : f32 to vector<8x256xf32>
    %14 = arith.maximumf %12, %13 : vector<8x256xf32>
    %c0_12 = arith.constant 0 : index
    %c0_13 = arith.constant 0 : index
    %15 = vector.load %arg6[%c0_12, %c0_13] : memref<128x256xf32, #tpu.memory_space<vmem>>, vector<128x256xf32>
    %cst_14 = arith.constant dense<0.000000e+00> : vector<8x128xf32>
    %16 = tpu.matmul %14, %15, %cst_14 {dimension_numbers = #tpu.dot_dimension_numbers<[1], [1], [0], [0], [0, 0, 1, 0], [], []>} : vector<8x256xf32>, vector<128x256xf32>, vector<8x128xf32> -> vector<8x128xf32>
    %c0_15 = arith.constant 0 : index
    %c0_16 = arith.constant 0 : index
    %17 = vector.load %arg7[%c0_15, %c0_16] : memref<1x128xf32, #tpu.memory_space<vmem>>, vector<1x128xf32>
    %18 = vector.broadcast %17 : vector<1x128xf32> to vector<8x128xf32>
    %19 = arith.addf %16, %18 : vector<8x128xf32>
    %20 = math.tanh %19 : vector<8x128xf32>
    %c0_17 = arith.constant 0 : index
    %c0_18 = arith.constant 0 : index
    %21 = vector.load %arg8[%c0_17, %c0_18] : memref<8x128xf32, #tpu.memory_space<vmem>>, vector<8x128xf32>
    tpu.vector_store %arg8[%c0_17, %c0_18], %20 {strides = array<i32>} : memref<8x128xf32, #tpu.memory_space<vmem>>, vector<8x128xf32>,
    return
  }
  func.func @transform_0(%arg0: i32) -> (i32, i32) {
    %c0_i32 = arith.constant 0 : i32
    %c0_i32_0 = arith.constant 0 : i32
    return %arg0, %c0_i32 : i32, i32
  }
  func.func @transform_1(%arg0: i32) -> (i32, i32) {
    %c0_i32 = arith.constant 0 : i32
    %c0_i32_0 = arith.constant 0 : i32
    %c0_i32_1 = arith.constant 0 : i32
    return %c0_i32, %c0_i32_0 : i32, i32
  }
  func.func @transform_2(%arg0: i32) -> (i32, i32) {
    %c0_i32 = arith.constant 0 : i32
    %c0_i32_0 = arith.constant 0 : i32
    %c0_i32_1 = arith.constant 0 : i32
    return %c0_i32, %c0_i32_0 : i32, i32
  }
  func.func @transform_3(%arg0: i32) -> (i32, i32) {
    %c0_i32 = arith.constant 0 : i32
    %c0_i32_0 = arith.constant 0 : i32
    %c0_i32_1 = arith.constant 0 : i32
    return %c0_i32, %c0_i32_0 : i32, i32
  }
  func.func @transform_4(%arg0: i32) -> (i32, i32) {
    %c0_i32 = arith.constant 0 : i32
    %c0_i32_0 = arith.constant 0 : i32
    %c0_i32_1 = arith.constant 0 : i32
    return %c0_i32, %c0_i32_0 : i32, i32
  }
  func.func @transform_5(%arg0: i32) -> (i32, i32) {
    %c0_i32 = arith.constant 0 : i32
    %c0_i32_0 = arith.constant 0 : i32
    %c0_i32_1 = arith.constant 0 : i32
    return %c0_i32, %c0_i32_0 : i32, i32
  }
  func.func @transform_6(%arg0: i32) -> (i32, i32) {
    %c0_i32 = arith.constant 0 : i32
    %c0_i32_0 = arith.constant 0 : i32
    %c0_i32_1 = arith.constant 0 : i32
    return %c0_i32, %c0_i32_0 : i32, i32
  }
  func.func @transform_7(%arg0: i32) -> (i32, i32) {
    %c0_i32 = arith.constant 0 : i32
    %c0_i32_0 = arith.constant 0 : i32
    return %arg0, %c0_i32 : i32, i32
  }
}

</mosaic_0001>

<bundles_post_ra>
// kernel: actor_forward.1
= control target key start
LH: loop header
LB: loop body
LE: loop exit
PB: predicated region body
PF: predicated region fallthrough
CT: control target
= control target key end

     0   :  { %12 = vsyncpa [#allocation3], 0  ;;  %s524_s27 = smov [#allocation2]   ;;  %s525_s29 = smov 256   ;;  %s811_s0 = inlined_call_operand.vmem [shape: f32[8,8], index: 0, kind: input, shape index: {}]   ;;  %s812_s1 = inlined_call_operand.vmem [shape: f32[256,8], index: 1, kind: input, shape index: {}]   ;;  %s813_s2 = inlined_call_operand.vmem [shape: f32[1,256], index: 2, kind: input, shape index: {}]   ;;  %s814_s3 = inlined_call_operand.hbm [shape: f32[256,256], index: 3, kind: input, shape index: {}]   ;;  %s815_s4 = inlined_call_operand.vmem [shape: f32[1,256], index: 4, kind: input, shape index: {}]   ;;  %s816_s5 = inlined_call_operand.vmem [shape: f32[128,256], index: 5, kind: input, shape index: {}]   ;;  %s817_s6 = inlined_call_operand.vmem [shape: f32[1,128], index: 6, kind: input, shape index: {}]   ;;  %s818_s7 = inlined_call_operand.vmem [shape: f32[8,128], index: 7, kind: output, shape index: {}]  }
   0x1   :  { %s23_s26 = sshll.u32 %s814_s3, 4  ;;  %s25_s28 = sshll.u32 %s524_s27, 4  ;;  %s24_s26 = int_to_ptr.hbm [resolvable:$true] %s23_s26  ;;  %s26_s28 = int_to_ptr.vmem [resolvable:$true] %s25_s28 }
   0x2   :  { %s526_s30 = smov 16  }
   0x3   :  { %31 = dma.hbm_to_vmem [thread:$0]  %s24_s26, 8192, %s26_s28, [#allocation3], %s525_s29, %s525_s29, %s526_s30  }
   0x4   :  { %522 = dma.done.wait [#allocation3], 8192  }
   0x5   :  { %523 = vsyncadd [#allocation3], 4294959104  ;;  %vm81_vm0 = vcmask 64512   ;;  %v58_v0 = vld [vmem:[%s812_s1 + $0x78] sm:$0xff]  ;;  %v57_v2 = vld [vmem:[%s812_s1 + $0x70] sm:$0xff] }
   0x6   :  { %v74_v1 = vld [vmem:[%s812_s1 + $0xf8] sm:$0xff]  ;;  %458 = vmatpush.xpose.msk.msra.mxu0 %vm81_vm0, %v58_v0  ;;  %v73_v3 = vld [vmem:[%s812_s1 + $0xf0] sm:$0xff]  ;;  %v56_v4 = vld [vmem:[%s812_s1 + $0x68] sm:$0xff] }
   0x7   :  { %475 = vmatpush.xpose.msk.msra.mxu1 %vm81_vm0, %v74_v1  ;;  %v72_v5 = vld [vmem:[%s812_s1 + $0xe8] sm:$0xff]  ;;  %v55_v6 = vld [vmem:[%s812_s1 + $0x60] sm:$0xff]  ;;  %v54_v8 = vld [vmem:[%s812_s1 + $0x58] sm:$0xff] }
   0x8   :  { %v71_v7 = vld [vmem:[%s812_s1 + $0xe0] sm:$0xff]  ;;  %v70_v9 = vld [vmem:[%s812_s1 + $0xd8] sm:$0xff]  ;;  %v53_v10 = vld [vmem:[%s812_s1 + $0x50] sm:$0xff] }
   0x9   :  { %v69_v11 = vld [vmem:[%s812_s1 + $0xd0] sm:$0xff]  ;;  %v52_v12 = vld [vmem:[%s812_s1 + $0x48] sm:$0xff]  ;;  %v51_v14 = vld [vmem:[%s812_s1 + $0x40] sm:$0xff] }
   0xa   :  { %459 = vmatpush.xpose.msk.msra.mxu0 %vm81_vm0, %v57_v2  ;;  %v68_v13 = vld [vmem:[%s812_s1 + $0xc8] sm:$0xff]  ;;  %v67_v15 = vld [vmem:[%s812_s1 + $0xc0] sm:$0xff]  ;;  %v50_v16 = vld [vmem:[%s812_s1 + $0x38] sm:$0xff] }
   0xb   :  { %476 = vmatpush.xpose.msk.msra.mxu1 %vm81_vm0, %v73_v3  ;;  %v66_v17 = vld [vmem:[%s812_s1 + $0xb8] sm:$0xff]  ;;  %v253_v18 = vld [vmem:[#allocation2 + $0xf0] sm:$0xff]  ;;  %v251_v22 = vld [vmem:[#allocation2 + $0xe0] sm:$0xff] }
   0xc   :  { %v254_v19 = vld [vmem:[#allocation2 + $0xf8] sm:$0xff]  ;;  %v49_v20 = vld [vmem:[%s812_s1 + $0x30] sm:$0xff]  ;;  %293 = vmatpush.xpose.msra.mxu2 %v253_v18  ;;  %v252_v23 = vld [vmem:[#allocation2 + $0xe8] sm:$0xff] }
   0xd   :  { %v65_v21 = vld [vmem:[%s812_s1 + $0xb0] sm:$0xff]  ;;  %313 = vmatpush.xpose.msra.mxu3 %v254_v19  ;;  %v48_v24 = vld [vmem:[%s812_s1 + $0x28] sm:$0xff]  ;;  %v250_v27 = vld [vmem:[#allocation2 + $0xd8] sm:$0xff] }
   0xe   :  { %460 = vmatpush.xpose.msk.msra.mxu0 %vm81_vm0, %v56_v4  ;;  %v64_v25 = vld [vmem:[%s812_s1 + $0xa8] sm:$0xff]  ;;  %v249_v26 = vld [vmem:[#allocation2 + $0xd0] sm:$0xff]  ;;  %v47_v28 = vld [vmem:[%s812_s1 + $0x20] sm:$0xff] }
   0xf   :  { %477 = vmatpush.xpose.msk.msra.mxu1 %vm81_vm0, %v72_v5  ;;  %v63_v29 = vld [vmem:[%s812_s1 + $0xa0] sm:$0xff]  ;;  %v248_v31 = vld [vmem:[#allocation2 + $0xc8] sm:$0xff]  ;;  %v46_v32 = vld [vmem:[%s812_s1 + $0x18] sm:$0xff] }
  0x10   :  { %294 = vmatpush.xpose.msra.mxu2 %v251_v22  ;;  %v247_v30 = vld [vmem:[#allocation2 + $0xc0] sm:$0xff]  ;;  %v62_v33 = vld [vmem:[%s812_s1 + $0x98] sm:$0xff]  ;;  %v245_v34 = vld [vmem:[#allocation2 + $0xb0] sm:$0xff] }
  0x11   :  { %314 = vmatpush.xpose.msra.mxu3 %v252_v23  ;;  %v246_v35 = vld [vmem:[#allocation2 + $0xb8] sm:$0xff]  ;;  %v45_v36 = vld [vmem:[%s812_s1 + $0x10] sm:$0xff]  ;;  %v243_v38 = vld [vmem:[#allocation2 + $0xa0] sm:$0xff] }
  0x12   :  { %461 = vmatpush.xpose.msk.msra.mxu0 %vm81_vm0, %v55_v6  ;;  %v61_v37 = vld [vmem:[%s812_s1 + $0x90] sm:$0xff]  ;;  %v244_v39 = vld [vmem:[#allocation2 + $0xa8] sm:$0xff]  ;;  %v242_v43 = vld [vmem:[#allocation2 + $0x98] sm:$0xff] }
  0x13   :  { %478 = vmatpush.xpose.msk.msra.mxu1 %vm81_vm0, %v71_v7  ;;  %v44_v40 = vld [vmem:[%s812_s1 + $0x8] sm:$0xff]  ;;  %v241_v42 = vld [vmem:[#allocation2 + $0x90] sm:$0xff]  ;;  %v43_v44 = vld [vmem:[%s812_s1] sm:$0xff] }
  0x14   :  { %295 = vmatpush.xpose.msra.mxu2 %v249_v26  ;;  %v60_v41 = vld [vmem:[%s812_s1 + $0x88] sm:$0xff]  ;;  %v59_v45 = vld [vmem:[%s812_s1 + $0x80] sm:$0xff]  ;;  %v285_v46 = vld [vmem:[#allocation2 + $0x1f0] sm:$0xff] }
  0x15   :  { %315 = vmatpush.xpose.msra.mxu3 %v250_v27  ;;  %v286_v47 = vld [vmem:[#allocation2 + $0x1f8] sm:$0xff]  ;;  %v239_v48 = vld [vmem:[#allocation2 + $0x80] sm:$0xff]  ;;  %v240_v49 = vld [vmem:[#allocation2 + $0x88] sm:$0xff] }
  0x16   :  { %462 = vmatpush.xpose.msk.msra.mxu0 %vm81_vm0, %v54_v8  ;;  %v42_v50 = vld [vmem:[%s811_s0] sm:$0xff]  ;;  %v284_v52 = vld [vmem:[#allocation2 + $0x1e8] sm:$0xff]  ;;  %v237_v53 = vld [vmem:[#allocation2 + $0x70] sm:$0xff] }
  0x17   :  { %479 = vmatpush.xpose.msk.msra.mxu1 %vm81_vm0, %v70_v9  ;;  %v283_v51 = vld [vmem:[#allocation2 + $0x1e0] sm:$0xff]  ;;  %v238_v54 = vld [vmem:[#allocation2 + $0x78] sm:$0xff]  ;;  %v281_v55 = vld [vmem:[#allocation2 + $0x1d0] sm:$0xff] }
  0x18   :  { %296 = vmatpush.xpose.msra.mxu2 %v247_v30  ;;  %v282_v56 = vld [vmem:[#allocation2 + $0x1d8] sm:$0xff]  ;;  %v235_v57 = vld [vmem:[#allocation2 + $0x60] sm:$0xff]  ;;  %v236_v58 = vld [vmem:[#allocation2 + $0x68] sm:$0xff] }
  0x19   :  { %316 = vmatpush.xpose.msra.mxu3 %v248_v31  ;;  %v279_v59 = vld [vmem:[#allocation2 + $0x1c0] sm:$0xff]  ;;  %v280_v60 = vld [vmem:[#allocation2 + $0x1c8] sm:$0xff]  ;;  %v233_v61 = vld [vmem:[#allocation2 + $0x50] sm:$0xff] }
  0x1a   :  { %463 = vmatpush.xpose.msk.msra.mxu0 %vm81_vm0, %v53_v10  ;;  %v234_v62 = vld [vmem:[#allocation2 + $0x58] sm:$0xff]  ;;  %v277_v63 = vld [vmem:[#allocation2 + $0x1b0] sm:$0xff]  ;;  %v231_v1 = vld [vmem:[#allocation2 + $0x40] sm:$0xff] }
  0x1b   :  { %480 = vmatpush.xpose.msk.msra.mxu1 %vm81_vm0, %v69_v11  ;;  %v278_v0 = vld [vmem:[#allocation2 + $0x1b8] sm:$0xff]  ;;  %v232_v2 = vld [vmem:[#allocation2 + $0x48] sm:$0xff]  ;;  %v275_v3 = vld [vmem:[#allocation2 + $0x1a0] sm:$0xff] }
  0x1c   :  { %297 = vmatpush.xpose.msra.mxu2 %v245_v34  ;;  %v276_v4 = vld [vmem:[#allocation2 + $0x1a8] sm:$0xff]  ;;  %v229_v5 = vld [vmem:[#allocation2 + $0x30] sm:$0xff]  ;;  %v230_v6 = vld [vmem:[#allocation2 + $0x38] sm:$0xff] }
  0x1d   :  { %317 = vmatpush.xpose.msra.mxu3 %v246_v35  ;;  %v273_v7 = vld [vmem:[#allocation2 + $0x190] sm:$0xff]  ;;  %v274_v8 = vld [vmem:[#allocation2 + $0x198] sm:$0xff]  ;;  %v227_v9 = vld [vmem:[#allocation2 + $0x20] sm:$0xff] }
  0x1e   :  { %464 = vmatpush.xpose.msk.msra.mxu0 %vm81_vm0, %v52_v12  ;;  %v228_v10 = vld [vmem:[#allocation2 + $0x28] sm:$0xff]  ;;  %v271_v11 = vld [vmem:[#allocation2 + $0x180] sm:$0xff]  ;;  %v265_v18 = vld [vmem:[#allocation2 + $0x150] sm:$0xff] }
  0x1f   :  { %481 = vmatpush.xpose.msk.msra.mxu1 %vm81_vm0, %v68_v13  ;;  %v272_v12 = vld [vmem:[#allocation2 + $0x188] sm:$0xff]  ;;  %v225_v13 = vld [vmem:[#allocation2 + $0x10] sm:$0xff]  ;;  %v266_v19 = vld [vmem:[#allocation2 + $0x158] sm:$0xff] }
  0x20   :  { %298 = vmatpush.xpose.msra.mxu2 %v243_v38  ;;  %v261_v22 = vld [vmem:[#allocation2 + $0x130] sm:$0xff]  ;;  %v262_v23 = vld [vmem:[#allocation2 + $0x138] sm:$0xff]  ;;  %v255_v30 = vld [vmem:[#allocation2 + $0x100] sm:$0xff] }
  0x21   :  { %318 = vmatpush.xpose.msra.mxu3 %v244_v39  ;;  %v257_v26 = vld [vmem:[#allocation2 + $0x110] sm:$0xff]  ;;  %v226_v27 = vld [vmem:[#allocation2 + $0x18] sm:$0xff]  ;;  %v224_v31 = vld [vmem:[#allocation2 + $0x8] sm:$0xff] }
  0x22   :  { %465 = vmatpush.xpose.msk.msra.mxu0 %vm81_vm0, %v51_v14  ;;  %v269_v14 = vld [vmem:[#allocation2 + $0x170] sm:$0xff]  ;;  %v404_v35 = vld [vmem:[%s816_s5 + $0xe8] sm:$0xff] }
  0x23   :  { %482 = vmatpush.xpose.msk.msra.mxu1 %vm81_vm0, %v67_v15  ;;  %v270_v15 = vld [vmem:[#allocation2 + $0x178] sm:$0xff]  ;;  %v405_v34 = vld [vmem:[%s816_s5 + $0xf0] sm:$0xff]  ;;  %v400_v39 = vld [vmem:[%s816_s5 + $0xc8] sm:$0xff] }
  0x24   :  { %299 = vmatpush.xpose.msra.mxu2 %v241_v42  ;;  %v401_v38 = vld [vmem:[%s816_s5 + $0xd0] sm:$0xff] }
  0x25   :  { %319 = vmatpush.xpose.msra.mxu3 %v242_v43  ;;  %v397_v42 = vld [vmem:[%s816_s5 + $0xb0] sm:$0xff]  ;;  %v396_v43 = vld [vmem:[%s816_s5 + $0xa8] sm:$0xff] }
  0x26   :  { %466 = vmatpush.xpose.msk.msra.mxu0 %vm81_vm0, %v50_v16  ;;  %v267_v16 = vld [vmem:[#allocation2 + $0x160] sm:$0xff] }
  0x27   :  { %483 = vmatpush.xpose.msk.msra.mxu1 %vm81_vm0, %v66_v17  ;;  %v268_v17 = vld [vmem:[#allocation2 + $0x168] sm:$0xff] }
  0x28   :  { %300 = vmatpush.xpose.msra.mxu2 %v239_v48 }
  0x29   :  { %320 = vmatpush.xpose.msra.mxu3 %v240_v49 }
  0x2a   :  { %467 = vmatpush.xpose.msk.msra.mxu0 %vm81_vm0, %v49_v20  ;;  %v263_v20 = vld [vmem:[#allocation2 + $0x140] sm:$0xff] }
  0x2b   :  { %484 = vmatpush.xpose.msk.msra.mxu1 %vm81_vm0, %v65_v21  ;;  %v264_v21 = vld [vmem:[#allocation2 + $0x148] sm:$0xff] }
  0x2c   :  { %301 = vmatpush.xpose.msra.mxu2 %v237_v53  ;;  %v391_v53 = vld [vmem:[%s816_s5 + $0x80] sm:$0xff] }
  0x2d   :  { %321 = vmatpush.xpose.msra.mxu3 %v238_v54 }
  0x2e   :  { %468 = vmatpush.xpose.msk.msra.mxu0 %vm81_vm0, %v48_v24  ;;  %v259_v24 = vld [vmem:[#allocation2 + $0x120] sm:$0xff] }
  0x2f   :  { %485 = vmatpush.xpose.msk.msra.mxu1 %vm81_vm0, %v64_v25  ;;  %v260_v25 = vld [vmem:[#allocation2 + $0x128] sm:$0xff] }
  0x30   :  { %302 = vmatpush.xpose.msra.mxu2 %v235_v57 }
  0x31   :  { %322 = vmatpush.xpose.msra.mxu3 %v236_v58  ;;  %v390_v58 = vld [vmem:[%s816_s5 + $0x78] sm:$0xff] }
  0x32   :  { %469 = vmatpush.xpose.msk.msra.mxu0 %vm81_vm0, %v47_v28  ;;  %v258_v28 = vld [vmem:[#allocation2 + $0x118] sm:$0xff] }
  0x33   :  { %486 = vmatpush.xpose.msk.msra.mxu1 %vm81_vm0, %v63_v29  ;;  %v223_v29 = vld [vmem:[#allocation2] sm:$0xff] }
  0x34   :  { %303 = vmatpush.xpose.msra.mxu2 %v233_v61  ;;  %v387_v61 = vld [vmem:[%s816_s5 + $0x60] sm:$0xff] }
  0x35   :  { %323 = vmatpush.xpose.msra.mxu3 %v234_v62  ;;  %v386_v62 = vld [vmem:[%s816_s5 + $0x58] sm:$0xff] }
  0x36   :  { %470 = vmatpush.xpose.msk.msra.mxu0 %vm81_vm0, %v46_v32  ;;  %v256_v32 = vld [vmem:[#allocation2 + $0x108] sm:$0xff] }
  0x37   :  { %487 = vmatpush.xpose.msk.msra.mxu1 %vm81_vm0, %v62_v33  ;;  %v406_v33 = vld [vmem:[%s816_s5 + $0xf8] sm:$0xff] }
  0x38   :  { %304 = vmatpush.xpose.msra.mxu2 %v231_v1  ;;  %v383_v1 = vld [vmem:[%s816_s5 + $0x40] sm:$0xff] }
  0x39   :  { %324 = vmatpush.xpose.msra.mxu3 %v232_v2  ;;  %v382_v2 = vld [vmem:[%s816_s5 + $0x38] sm:$0xff] }
  0x3a   :  { %471 = vmatpush.xpose.msk.msra.mxu0 %vm81_vm0, %v45_v36  ;;  %v403_v36 = vld [vmem:[%s816_s5 + $0xe0] sm:$0xff] }
  0x3b   :  { %488 = vmatpush.xpose.msk.msra.mxu1 %vm81_vm0, %v61_v37  ;;  %v402_v37 = vld [vmem:[%s816_s5 + $0xd8] sm:$0xff] }
  0x3c   :  { %305 = vmatpush.xpose.msra.mxu2 %v229_v5  ;;  %v378_v5 = vld [vmem:[%s816_s5 + $0x18] sm:$0xff] }
  0x3d   :  { %325 = vmatpush.xpose.msra.mxu3 %v230_v6  ;;  %v379_v6 = vld [vmem:[%s816_s5 + $0x20] sm:$0xff] }
  0x3e   :  { %472 = vmatpush.xpose.msk.msra.mxu0 %vm81_vm0, %v44_v40  ;;  %v399_v40 = vld [vmem:[%s816_s5 + $0xc0] sm:$0xff] }
  0x3f   :  { %489 = vmatpush.xpose.msk.msra.mxu1 %vm81_vm0, %v60_v41  ;;  %v398_v41 = vld [vmem:[%s816_s5 + $0xb8] sm:$0xff] }
  0x40   :  { %306 = vmatpush.xpose.msra.mxu2 %v227_v9  ;;  %v375_v9 = vld [vmem:[%s816_s5] sm:$0xff] }
  0x41   :  { %326 = vmatpush.xpose.msra.mxu3 %v228_v10  ;;  %v287_v10 = vld [vmem:[%s815_s4] sm:$0x3] }
  0x42   :  { %473 = vmatpush.xpose.msk.msra.mxu0 %vm81_vm0, %v43_v44  ;;  %v395_v44 = vld [vmem:[%s816_s5 + $0xa0] sm:$0xff] }
  0x43   :  { %490 = vmatpush.xpose.msk.msra.mxu1 %vm81_vm0, %v59_v45  ;;  %v75_v45 = vld [vmem:[%s813_s2] sm:$0x3] }
  0x44   :  { %307 = vmatpush.xpose.msra.mxu2 %v225_v13  ;;  %v77_v48 = vperm.slane %v75_v45, 0  ;;  %v78_v49 = vperm.slane %v75_v45, 1 }
  0x45   :  { %474 = vmatmul.msk.f32.vlgmr.msra.gmra.mxu0 %vm81_vm0, %v42_v50  ;;  %327 = vmatpush.xpose.msra.mxu3 %v226_v27 }
  0x46   :  { %333 = vmatpush.xpose.msrb.mxu0 %v285_v46  ;;  %491 = vmatmul.msk.f32.vlgmr.msra.gmra.mxu1 %vm81_vm0, %v42_v50  ;;  %v394_v46 = vld [vmem:[%s816_s5 + $0x98] sm:$0xff] }
  0x47   :  { %353 = vmatpush.xpose.msrb.mxu1 %v286_v47  ;;  %v393_v47 = vld [vmem:[%s816_s5 + $0x90] sm:$0xff] }
  0x48   :  { %308 = vmatpush.xpose.msra.mxu2 %v223_v29 }
  0x49   :  { %328 = vmatpush.xpose.msra.mxu3 %v224_v31 }
  0x4a   :  { %334 = vmatpush.xpose.msrb.mxu0 %v283_v51 }
  0x4b   :  { %354 = vmatpush.xpose.msrb.mxu1 %v284_v52  ;;  %v392_v52 = vld [vmem:[%s816_s5 + $0x88] sm:$0xff] }
  0x4c   :  { %411 = vmatpush.xpose.msrb.mxu2 %v405_v34 }
  0x4d   :  { %431 = vmatpush.xpose.msrb.mxu3 %v406_v33 }
  0x4e   :  { %335 = vmatpush.xpose.msrb.mxu0 %v281_v55 }
  0x4f   :  { %355 = vmatpush.xpose.msrb.mxu1 %v282_v56 }
  0x50   :  { %412 = vmatpush.xpose.msrb.mxu2 %v403_v36 }
  0x51   :  { %432 = vmatpush.xpose.msrb.mxu3 %v404_v35 }
  0x52   :  { %336 = vmatpush.xpose.msrb.mxu0 %v279_v59  ;;  %v389_v59 = vld [vmem:[%s816_s5 + $0x70] sm:$0xff] }
  0x53   :  { %356 = vmatpush.xpose.msrb.mxu1 %v280_v60  ;;  %v388_v60 = vld [vmem:[%s816_s5 + $0x68] sm:$0xff] }
  0x54   :  { %413 = vmatpush.xpose.msrb.mxu2 %v401_v38 }
  0x55   :  { %433 = vmatpush.xpose.msrb.mxu3 %v402_v37 }
  0x56   :  { %337 = vmatpush.xpose.msrb.mxu0 %v277_v63  ;;  %v385_v63 = vld [vmem:[%s816_s5 + $0x50] sm:$0xff] }
  0x57   :  { %357 = vmatpush.xpose.msrb.mxu1 %v278_v0  ;;  %v384_v0 = vld [vmem:[%s816_s5 + $0x48] sm:$0xff] }
  0x58   :  { %414 = vmatpush.xpose.msrb.mxu2 %v399_v40 }
  0x59   :  { %434 = vmatpush.xpose.msrb.mxu3 %v400_v39 }
  0x5a   :  { %338 = vmatpush.xpose.msrb.mxu0 %v275_v3  ;;  %v381_v3 = vld [vmem:[%s816_s5 + $0x30] sm:$0xff] }
  0x5b   :  { %358 = vmatpush.xpose.msrb.mxu1 %v276_v4  ;;  %v380_v4 = vld [vmem:[%s816_s5 + $0x28] sm:$0xff] }
  0x5c   :  { %415 = vmatpush.xpose.msrb.mxu2 %v397_v42 }
  0x5d   :  { %435 = vmatpush.xpose.msrb.mxu3 %v398_v41 }
  0x5e   :  { %339 = vmatpush.xpose.msrb.mxu0 %v273_v7  ;;  %v376_v7 = vld [vmem:[%s816_s5 + $0x8] sm:$0xff] }
  0x5f   :  { %359 = vmatpush.xpose.msrb.mxu1 %v274_v8  ;;  %v377_v8 = vld [vmem:[%s816_s5 + $0x10] sm:$0xff] }
  0x60   :  { %416 = vmatpush.xpose.msrb.mxu2 %v395_v44 }
  0x61   :  { %436 = vmatpush.xpose.msrb.mxu3 %v396_v43 }
  0x62   :  { %340 = vmatpush.xpose.msrb.mxu0 %v271_v11  ;;  %v290_v11 = vperm.slane %v287_v10, 1 }
  0x63   :  { %360 = vmatpush.xpose.msrb.mxu1 %v272_v12 }
  0x64   :  { %417 = vmatpush.xpose.msrb.mxu2 %v393_v47 }
  0x65   :  { %437 = vmatpush.xpose.msrb.mxu3 %v394_v46 }
  0x66   :  { %341 = vmatpush.xpose.msrb.mxu0 %v269_v14 }
  0x67   :  { %361 = vmatpush.xpose.msrb.mxu1 %v270_v15 }
  0x68   :  { %418 = vmatpush.xpose.msrb.mxu2 %v391_v53 }
  0x69   :  { %438 = vmatpush.xpose.msrb.mxu3 %v392_v52 }
  0x6a   :  { %342 = vmatpush.xpose.msrb.mxu0 %v267_v16  ;;  %v289_v16 = vperm.slane %v287_v10, 0 }
  0x6b   :  { %362 = vmatpush.xpose.msrb.mxu1 %v268_v17 }
  0x6c   :  { %419 = vmatpush.xpose.msrb.mxu2 %v389_v59 }
  0x6d   :  { %439 = vmatpush.xpose.msrb.mxu3 %v390_v58 }
  0x6e   :  { %343 = vmatpush.xpose.msrb.mxu0 %v265_v18 }
  0x6f   :  { %363 = vmatpush.xpose.msrb.mxu1 %v266_v19 }
  0x70   :  { %420 = vmatpush.xpose.msrb.mxu2 %v387_v61 }
  0x71   :  { %440 = vmatpush.xpose.msrb.mxu3 %v388_v60 }
  0x72   :  { %344 = vmatpush.xpose.msrb.mxu0 %v263_v20 }
  0x73   :  { %364 = vmatpush.xpose.msrb.mxu1 %v264_v21 }
  0x74   :  { %421 = vmatpush.xpose.msrb.mxu2 %v385_v63 }
  0x75   :  { %441 = vmatpush.xpose.msrb.mxu3 %v386_v62 }
  0x76   :  { %345 = vmatpush.xpose.msrb.mxu0 %v261_v22 }
  0x77   :  { %365 = vmatpush.xpose.msrb.mxu1 %v262_v23  ;;  %v495_v23 = vld [vmem:[%s817_s6] ss:$0 sm:$0xff] }
  0x78   :  { %422 = vmatpush.xpose.msrb.mxu2 %v383_v1 }
  0x79   :  { %442 = vmatpush.xpose.msrb.mxu3 %v384_v0 }
  0x7a   :  { %346 = vmatpush.xpose.msrb.mxu0 %v259_v24 }
  0x7b   :  { %366 = vmatpush.xpose.msrb.mxu1 %v260_v25 }
  0x7c   :  { %423 = vmatpush.xpose.msrb.mxu2 %v381_v3 }
  0x7d   :  { %443 = vmatpush.xpose.msrb.mxu3 %v382_v2 }
  0x7e   :  { %347 = vmatpush.xpose.msrb.mxu0 %v257_v26 }
  0x7f   :  { %367 = vmatpush.xpose.msrb.mxu1 %v258_v28 }
  0x80   :  { %424 = vmatpush.xpose.msrb.mxu2 %v379_v6 }
  0x81   :  { %444 = vmatpush.xpose.msrb.mxu3 %v380_v4 }
  0x82   :  { %348 = vmatpush.xpose.msrb.mxu0 %v255_v30 }
  0x83   :  { %368 = vmatpush.xpose.msrb.mxu1 %v256_v32 }
  0x84   :  { %425 = vmatpush.xpose.msrb.mxu2 %v377_v8 }
  0x85   :  { %445 = vmatpush.xpose.msrb.mxu3 %v378_v5 }
  0x88   :  { %426 = vmatpush.xpose.msrb.mxu2 %v375_v9 }
  0x89   :  { %446 = vmatpush.xpose.msrb.mxu3 %v376_v7 }
  0xc2   :  { %v198_v50 = vpop.f32.mrf.mxu0 }
  0xc3   :  { %v218_v51 = vpop.f32.mrf.mxu1  ;;  %v199_v54 = vadd.f32 %v198_v50, %v77_v48 }
  0xc4   :  { %v219_v55 = vadd.f32 %v218_v51, %v78_v49 }
  0xc5   :  { %v221_v56 = vmax.f32 %v199_v54, 0.0 }
  0xc6   :  { %v222_v57 = vmax.f32 %v219_v55, 0.0 }
  0xc7   :  { %309 = vmatmul.f32.vlgmr.msra.gmra.mxu2 %v221_v56  ;;  %349 = vmatmul.f32.vlgmr.msrb.gmra.mxu0 %v221_v56 }
  0xc8   :  { %329 = vmatmul.f32.vlgmr.msra.gmra.mxu3 %v222_v57  ;;  %369 = vmatmul.f32.vlgmr.msrb.gmra.mxu1 %v222_v57 }
 0x144   :  { %v350_v12 = vpop.f32.mrf.mxu0 }
 0x145   :  { %v351_v13 = vadd.f32 %v350_v12, %v290_v11  ;;  %v370_v14 = vpop.f32.mrf.mxu1 }
 0x147   :  { %v371_v15 = vadd.f32 %v370_v14, %v351_v13 }
 0x149   :  { %v374_v17 = vmax.f32 %v371_v15, 0.0 }
 0x14a   :  { %v310_v18 = vpop.f32.mrf.mxu2 }
 0x14b   :  { %v311_v19 = vadd.f32 %v310_v18, %v289_v16  ;;  %447 = vmatmul.f32.vlgmr.msrb.gmra.mxu3 %v374_v17  ;;  %v330_v20 = vpop.f32.mrf.mxu3 }
 0x14d   :  { %v331_v21 = vadd.f32 %v330_v20, %v311_v19 }
 0x14f   :  { %v373_v22 = vmax.f32 %v331_v21, 0.0 }
 0x151   :  { %427 = vmatmul.f32.vlgmr.msrb.gmra.mxu2 %v373_v22 }
 0x1ce   :  { %v448_v26 = vpop.f32.mrf.mxu3 }
 0x1d4   :  { %v428_v24 = vpop.f32.mrf.mxu2 }
 0x1d5   :  { %v429_v25 = vadd.f32 %v495_v23, %v428_v24 }
 0x1d7   :  { %v449_v27 = vadd.f32 %v448_v26, %v429_v25 }
 0x1d9   :  { %496 = vtanh.f32 %v449_v27 }
 0x1df   :  { %v497_v28 = vpop.eup %496 }
 0x1e0   :  { %452 = vst [vmem:[%s818_s7] sm:$0xff] %v497_v28 }
 0x1e1   :  { %457 = vsyncpa [#allocation3], 1 }

</bundles_post_ra>
